<compile_context>
chip_gen: v6e
topology: v6e:2x2x1
jax: 0.10.0
libtpu: 0.0.40
codegen_flags: <defaults>
</compile_context>

<pallas_src>
import functools

import numpy as np
import jax
import jax.numpy as jnp
from jax.experimental import pallas as pl
from jax.experimental.pallas import tpu as pltpu

LN_EPS = 1e-5        # torch.nn.LayerNorm default
MAX_TILE_M = 128     # row-tile cap; sweep 256-512 on v6e for large M (raise vmem_limit_bytes)


def _round_up(x, m):
    return (x + m - 1) // m * m


def _pick_tile(M, max_tile=MAX_TILE_M):
    """Row tile (multiple of 8) and padded row count.

    Prefers >= 2 grid steps so dimension_semantics=("parallel",) can shard the
    row tiles across v7x's two TensorCores (no-op on v5e/v6e).
    """
    tile = min(max_tile, _round_up(M, 8))
    m_pad = _round_up(M, tile)
    if m_pad // tile < 2 and M > 8:
        tile = _round_up(pl.cdiv(M, 2), 8)
        m_pad = _round_up(M, tile)
    return tile, m_pad


# --------------------------------------------------------------------------
# One-time parameter packing (load time, NOT per forward call)
# --------------------------------------------------------------------------
def pack_embedding_params(params, io_dtype=jnp.float32):
    """Packs embeddings weights for the fused kernel.

    io_dtype controls HBM-facing storage (bfloat16 on v6e/v7x halves bandwidth;
    keep float32 on v5e).  LayerNorm gamma/beta stay float32 (VPU operands).
    """
    o_dim, d = params["ws"].shape
    a_dim = params["wa"].shape[0]
    dp = _round_up(d, 128)          # lane-pad d_model -> every store is a full vst
    C = o_dim + a_dim + 2           # [states | actions | returns2go | ones]
    f32 = jnp.float32

    # Block-packed fused weight (C, 3*dp): cols [0:dp)=return, [dp:2dp)=state,
    # [2dp:3dp)=action; biases folded into the trailing "ones" row.
    w = jnp.zeros((C, 3 * dp), f32)
    w = w.at[o_dim + a_dim, 0:d].set(params["wr"][0])            # return weight
    w = w.at[C - 1, 0:d].set(params["br"][0])                    # return bias
    w = w.at[0:o_dim, dp:dp + d].set(params["ws"])               # state weight
    w = w.at[o_dim:o_dim + a_dim, 2 * dp:2 * dp + d].set(params["wa"])  # action w
    w = w.at[C - 1, 2 * dp:2 * dp + d].set(params["ba"][0])      # action bias

    T = params["emb_table"].shape[0]
    t_pad = _round_up(T, 8)
    tab = jnp.zeros((t_pad, dp), f32).at[:T, :d].set(params["emb_table"])
    gamma = jnp.zeros((1, dp), f32).at[:, :d].set(params["gamma"])
    beta = jnp.zeros((1, dp), f32).at[:, :d].set(params["beta"])

    return {
        "w": w.astype(io_dtype),
        "tab": tab.astype(io_dtype),
        "gamma": gamma,            # f32 (padding cols exactly zero -> LN exact)
        "beta": beta,              # f32
        "d": d, "dp": dp, "o_dim": o_dim, "a_dim": a_dim,
        "C": C, "t_pad": t_pad,
    }


def pack_action_head(w_proj, dp, io_dtype=jnp.float32):
    """One-time packing of the action-projection weight to (dp, a_dim)."""
    d, a_dim = w_proj.shape
    wp = jnp.zeros((dp, a_dim), jnp.float32).at[:d, :].set(w_proj)
    return wp.astype(io_dtype)


# --------------------------------------------------------------------------
# Embeddings kernel
# --------------------------------------------------------------------------
def _embeddings_kernel(x_ref, ts_ref, w_ref, tab_ref, g_ref, b_ref, out_ref,
                       *, d_true, dp):
    x = x_ref[...]                        # (TM, C)  = [states | actions | r2g | 1]
    ts = ts_ref[...]                      # (TM, 1)  int32 timesteps

    # In-kernel timestep-embedding gather: one-hot matmul against the
    # VMEM-resident table (no (B, K, d) t_emb round-trip through HBM).
    # TODO(synk): for realistic max_timestep (>~1k) switch to a scalar-prefetch
    # DMA row gather; the one-hot contraction is only cheap for small tables.
    tm = x.shape[0]
    t_rows = tab_ref.shape[0]
    onehot = (ts == jax.lax.broadcasted_iota(jnp.int32, (tm, t_rows), 1)
              ).astype(tab_ref.dtype)                                    # (TM, T)
    te = jnp.dot(onehot, tab_ref[...],
                 preferred_element_type=jnp.float32)                     # (TM, dp) f32

    gamma = g_ref[...]                    # (1, dp) f32, zero in padding columns
    beta = b_ref[...]                     # (1, dp) f32
    inv_d = 1.0 / float(d_true)

    # Per-slot matmul + single-pass LayerNorm + direct store: only one (TM, dp)
    # slot is live at a time (no (TM, 3*dp) emb, no concatenate), and dp is a
    # multiple of 128 so each sliced store is an unmasked lane-dense vst.
    # Padding columns of emb/te/gamma/beta are exactly zero and inv_d uses the
    # true d_model, so the LN statistics are exact.
    for j in range(3):                    # slot 0: return, 1: state, 2: action
        sl = slice(j * dp, (j + 1) * dp)
        emb = jnp.dot(x, w_ref[:, sl],
                      preferred_element_type=jnp.float32)                # (TM, dp) f32
        xb = emb + te
        mu = jnp.sum(xb, axis=-1, keepdims=True) * inv_d
        ex2 = jnp.sum(xb * xb, axis=-1, keepdims=True) * inv_d
        var = ex2 - mu * mu
        xn = (xb - mu) * jax.lax.rsqrt(var + LN_EPS)
        out_ref[:, sl] = (xn * gamma + beta).astype(out_ref.dtype)  # dropout==identity


def embeddings_forward(packed, states, actions, returns2go, timesteps,
                       *, max_tile=MAX_TILE_M):
    """Returns the lane-padded trajectory token slab (m_pad, 3*dp) plus tile_m.

    Downstream kernels (encoder / action head) consume this padded layout
    directly — there is no (B, 3K, d) strip pass on the hot path.
    """
    B, K, o_dim = states.shape
    a_dim = actions.shape[-1]
    d, dp, C, t_pad = packed["d"], packed["dp"], packed["C"], packed["t_pad"]
    io_dtype = packed["w"].dtype
    M = B * K
    tile_m, m_pad = _pick_tile(M, max_tile)

    # Per-call fused input (depends on the inputs, so it cannot be hoisted).
    x = jnp.concatenate(
        [states.reshape(M, o_dim).astype(jnp.float32),
         actions.reshape(M, a_dim).astype(jnp.float32),
         returns2go.reshape(M, 1).astype(jnp.float32),
         jnp.ones((M, 1), jnp.float32)], axis=-1).astype(io_dtype)
    x = jnp.pad(x, ((0, m_pad - M), (0, 0)))
    ts = jnp.pad(timesteps.reshape(M, 1).astype(jnp.int32),
                 ((0, m_pad - M), (0, 0)))

    out = pl.pallas_call(
        functools.partial(_embeddings_kernel, d_true=d, dp=dp),
        out_shape=jax.ShapeDtypeStruct((m_pad, 3 * dp), io_dtype),
        grid=(m_pad // tile_m,),
        in_specs=[
            pl.BlockSpec((tile_m, C), lambda i: (i, 0)),    # fused inputs (row tile)
            pl.BlockSpec((tile_m, 1), lambda i: (i, 0)),    # timesteps (row tile)
            # Grid-invariant resident operands.
            # TODO(synk): single-buffer these (and set vmem_limit_bytes) once
            # d_model / max_timestep are big enough to pressure v5e's 16 MiB /
            # v7x's 32 MiB scoped VMEM defaults.
            pl.BlockSpec((C, 3 * dp), lambda i: (0, 0)),    # fused weight
            pl.BlockSpec((t_pad, dp), lambda i: (0, 0)),    # timestep table
            pl.BlockSpec((1, dp), lambda i: (0, 0)),        # LN gamma (f32)
            pl.BlockSpec((1, dp), lambda i: (0, 0)),        # LN beta  (f32)
        ],
        out_specs=pl.BlockSpec((tile_m, 3 * dp), lambda i: (i, 0)),
        compiler_params=pltpu.CompilerParams(
            dimension_semantics=("parallel",)),
    )(x, ts, packed["w"], packed["tab"], packed["gamma"], packed["beta"])
    return out, tile_m


# --------------------------------------------------------------------------
# Action head kernel: Linear(d_model, a_dim, bias=False) -> tanh -> * max_action
# --------------------------------------------------------------------------
def _action_head_kernel(h_ref, w_ref, o_ref, *, max_action):
    scores = jnp.dot(h_ref[...], w_ref[...],
                     preferred_element_type=jnp.float32)
    o_ref[...] = (jnp.tanh(scores) * max_action).astype(o_ref.dtype)


def action_head_forward(wp, enc_out_padded, tile_m, max_action):
    """Action head on slot-1 tokens.

    The input DMA slices the slot-1 column block of the padded (m_pad, 3*dp)
    encoder output directly (index_map column block 1) — no wrapper gather.
    Output is stored unpadded (m_pad, a_dim): tiny tensor, no 32x-padded
    store + strip.
    """
    m_pad = enc_out_padded.shape[0]
    dp, a_dim = wp.shape
    return pl.pallas_call(
        functools.partial(_action_head_kernel, max_action=float(max_action)),
        out_shape=jax.ShapeDtypeStruct((m_pad, a_dim), jnp.float32),
        grid=(m_pad // tile_m,),
        in_specs=[
            pl.BlockSpec((tile_m, dp), lambda i: (i, 1)),   # slot-1 column block
            pl.BlockSpec((dp, a_dim), lambda i: (0, 0)),    # head weight (resident)
        ],
        out_specs=pl.BlockSpec((tile_m, a_dim), lambda i: (i, 0)),
        compiler_params=pltpu.CompilerParams(
            dimension_semantics=("parallel",)),
    )(enc_out_padded, wp)


# --------------------------------------------------------------------------
# Parameters + pure-JAX reference (mirrors the PyTorch module in eval mode)
# --------------------------------------------------------------------------
def make_params(key, d_model, o_dim, a_dim, max_timestep):
    ks = jax.random.split(key, 6)
    scale = 0.02
    return {
        # weights stored pre-transposed: x @ W  (W = torch_weight.T)
        "ws": (scale * jax.random.normal(ks[0], (o_dim, d_model))).astype(jnp.float32),
        "wa": (scale * jax.random.normal(ks[1], (a_dim, d_model))).astype(jnp.float32),
        "ba": (scale * jax.random.normal(ks[2], (1, d_model))).astype(jnp.float32),
        "wr": (scale * jax.random.normal(ks[3], (1, d_model))).astype(jnp.float32),
        "br": (scale * jax.random.normal(ks[4], (1, d_model))).astype(jnp.float32),
        "emb_table": (scale * jax.random.normal(ks[5], (max_timestep + 1, d_model))
                      ).astype(jnp.float32),
        "gamma": jnp.ones((1, d_model), jnp.float32),   # LayerNorm default init
        "beta": jnp.zeros((1, d_model), jnp.float32),
    }


def reference_forward(params, states, actions, returns2go, timesteps):
    t_emb = params["emb_table"][timesteps]
    s_emb = states @ params["ws"]
    a_emb = actions @ params["wa"] + params["ba"][0]
    r_emb = returns2go * params["wr"][0] + params["br"][0]

    def ln(x):
        x = x + t_emb
        mu = x.mean(-1, keepdims=True)
        var = ((x - mu) ** 2).mean(-1, keepdims=True)
        return (x - mu) / jnp.sqrt(var + LN_EPS) * params["gamma"][0] + params["beta"][0]

    traj = jnp.stack((ln(r_emb), ln(s_emb), ln(a_emb)), axis=1)   # (B, 3, K, d)
    traj = jnp.transpose(traj, (0, 2, 1, 3))                      # (B, K, 3, d)
    return traj.reshape(traj.shape[0], -1, traj.shape[-1])        # (B, 3K, d)


def unpack_traj(out_padded, B, K, d, dp):
    """TEST-ONLY: strip lane/row padding back to the reference (B, 3K, d)."""
    M = B * K
    return (out_padded[:M].astype(jnp.float32)
            .reshape(B, K, 3, dp)[..., :d].reshape(B, 3 * K, d))


# --------------------------------------------------------------------------
if __name__ == "__main__":
    B, K, o_dim, a_dim, d_model, max_timestep = 2, 8, 16, 4, 32, 64
    max_action = 2.0
    M = B * K

    key = jax.random.PRNGKey(0)
    kp, ks, ka, kr, kt, kw = jax.random.split(key, 6)

    params = make_params(kp, d_model, o_dim, a_dim, max_timestep)
    states = jax.random.normal(ks, (B, K, o_dim), jnp.float32)
    actions = jax.random.normal(ka, (B, K, a_dim), jnp.float32)
    returns2go = jax.random.normal(kr, (B, K, 1), jnp.float32)
    timesteps = jax.random.randint(kt, (B, K), 0, max_timestep + 1, jnp.int32)
    w_proj = (0.02 * jax.random.normal(kw, (d_model, a_dim))).astype(jnp.float32)

    ref_traj = reference_forward(params, states, actions, returns2go, timesteps)
    ref_tokens = ref_traj.reshape(B, K, 3, d_model)[:, :, 1, :]
    ref_scores = jnp.tanh(ref_tokens @ w_proj) * max_action

    # ---- float32 I/O path (v5e default; tight correctness check) ----------
    packed = pack_embedding_params(params, jnp.float32)       # once, at load time
    wp = pack_action_head(w_proj, packed["dp"], jnp.float32)  # once, at load time

    traj_pad, tile_m = embeddings_forward(packed, states, actions,
                                          returns2go, timesteps)
    traj_pad = jax.block_until_ready(traj_pad)

    # TODO(synk): the transformer `encoder` (with its causal/pad masks) is
    # external to this spec; treated as identity so the head runs on real data.
    enc_out = traj_pad
    scores_pad = jax.block_until_ready(
        action_head_forward(wp, enc_out, tile_m, max_action))
    action_scores = np.asarray(scores_pad)[:M].reshape(B, K, a_dim)

    traj = unpack_traj(traj_pad, B, K, d_model, packed["dp"])
    np.testing.assert_allclose(np.asarray(traj), np.asarray(ref_traj),
                               rtol=2e-4, atol=2e-4)
    np.testing.assert_allclose(action_scores, np.asarray(ref_scores),
                               rtol=2e-4, atol=2e-4)

    # ---- bfloat16 I/O path (v6e/v7x bandwidth; f32 accumulation/LN stats) --
    packed16 = pack_embedding_params(params, jnp.bfloat16)
    wp16 = pack_action_head(w_proj, packed16["dp"], jnp.bfloat16)
    traj_pad16, tile16 = embeddings_forward(packed16, states, actions,
                                            returns2go, timesteps)
    scores_pad16 = jax.block_until_ready(
        action_head_forward(wp16, jax.block_until_ready(traj_pad16),
                            tile16, max_action))
    scores16 = np.asarray(scores_pad16)[:M].reshape(B, K, a_dim)
    np.testing.assert_allclose(scores16, np.asarray(ref_scores),
                               rtol=5e-2, atol=5e-2)

    print("KERNEL_OK")
</pallas_src>

<mosaic_0001>
module attributes {stable_mosaic.version = 11 : i64} {
  func.func @_embeddings_kernel(%arg0: i32, %arg1: memref<8x22xf32, #tpu.memory_space<vmem>>, %arg2: memref<8x1xi32, #tpu.memory_space<vmem>>, %arg3: memref<22x384xf32, #tpu.memory_space<vmem>>, %arg4: memref<72x128xf32, #tpu.memory_space<vmem>>, %arg5: memref<1x128xf32, #tpu.memory_space<vmem>>, %arg6: memref<1x128xf32, #tpu.memory_space<vmem>>, %arg7: memref<8x384xf32, #tpu.memory_space<vmem>>) attributes {dimension_semantics = [#tpu.dimension_semantics<parallel>], iteration_bounds = array<i64: 2>, scalar_prefetch = 0 : i64, scratch_operands = 0 : i64, tpu.core_type = #tpu.core_type<tc>, window_params = [{transform_indices = @transform_0, window_bounds = array<i64: 8, 22>}, {transform_indices = @transform_1, window_bounds = array<i64: 8, 1>}, {pipeline_mode = #tpu.pipeline_mode<synchronous>, transform_indices = @transform_2, window_bounds = array<i64: 22, 384>}, {pipeline_mode = #tpu.pipeline_mode<synchronous>, transform_indices = @transform_3, window_bounds = array<i64: 72, 128>}, {pipeline_mode = #tpu.pipeline_mode<synchronous>, transform_indices = @transform_4, window_bounds = array<i64: 1, 128>}, {pipeline_mode = #tpu.pipeline_mode<synchronous>, transform_indices = @transform_5, window_bounds = array<i64: 1, 128>}, {transform_indices = @transform_6, window_bounds = array<i64: 8, 384>}]} {
    %c0 = arith.constant 0 : index
    %c0_0 = arith.constant 0 : index
    %0 = vector.load %arg1[%c0, %c0_0] : memref<8x22xf32, #tpu.memory_space<vmem>>, vector<8x22xf32>
    %c0_1 = arith.constant 0 : index
    %c0_2 = arith.constant 0 : index
    %1 = vector.load %arg2[%c0_1, %c0_2] : memref<8x1xi32, #tpu.memory_space<vmem>>, vector<8x1xi32>
    %2 = tpu.iota {dimensions = array<i32: 1>} : vector<8x72xi32>
    %3 = vector.broadcast %1 : vector<8x1xi32> to vector<8x72xi32>
    %4 = arith.cmpi eq, %3, %2 : vector<8x72xi32>
    %5 = arith.extui %4 : vector<8x72xi1> to vector<8x72xi32>
    %6 = arith.sitofp %5 : vector<8x72xi32> to vector<8x72xf32>
    %c0_3 = arith.constant 0 : index
    %c0_4 = arith.constant 0 : index
    %7 = vector.load %arg4[%c0_3, %c0_4] : memref<72x128xf32, #tpu.memory_space<vmem>>, vector<72x128xf32>
    %cst = arith.constant dense<0.000000e+00> : vector<8x128xf32>
    %8 = tpu.matmul %6, %7, %cst {dimension_numbers = #tpu.dot_dimension_numbers<[1], [0], [0], [1], [0, 0, 1, 1], [], []>} : vector<8x72xf32>, vector<72x128xf32>, vector<8x128xf32> -> vector<8x128xf32>
    %c0_5 = arith.constant 0 : index
    %c0_6 = arith.constant 0 : index
    %9 = vector.load %arg5[%c0_5, %c0_6] : memref<1x128xf32, #tpu.memory_space<vmem>>, vector<1x128xf32>
    %c0_7 = arith.constant 0 : index
    %c0_8 = arith.constant 0 : index
    %10 = vector.load %arg6[%c0_7, %c0_8] : memref<1x128xf32, #tpu.memory_space<vmem>>, vector<1x128xf32>
    %c0_9 = arith.constant 0 : index
    %c0_10 = arith.constant 0 : index
    %11 = vector.load %arg3[%c0_9, %c0_10] : memref<22x384xf32, #tpu.memory_space<vmem>>, vector<22x128xf32>
    %cst_11 = arith.constant dense<0.000000e+00> : vector<8x128xf32>
    %12 = tpu.matmul %0, %11, %cst_11 {dimension_numbers = #tpu.dot_dimension_numbers<[1], [0], [0], [1], [0, 0, 1, 1], [], []>} : vector<8x22xf32>, vector<22x128xf32>, vector<8x128xf32> -> vector<8x128xf32>
    %13 = arith.addf %12, %8 : vector<8x128xf32>
    %cst_12 = arith.constant dense<0.000000e+00> : vector<8xf32>
    %14 = vector.multi_reduction <add>, %13, %cst_12 [1] : vector<8x128xf32> to vector<8xf32>
    %15 = vector.shape_cast %14 : vector<8xf32> to vector<8x1xf32>
    %cst_13 = arith.constant 3.125000e-02 : f32
    %16 = vector.broadcast %cst_13 : f32 to vector<8x1xf32>
    %17 = arith.mulf %15, %16 : vector<8x1xf32>
    %18 = arith.mulf %13, %13 : vector<8x128xf32>
    %cst_14 = arith.constant dense<0.000000e+00> : vector<8xf32>
    %19 = vector.multi_reduction <add>, %18, %cst_14 [1] : vector<8x128xf32> to vector<8xf32>
    %20 = vector.shape_cast %19 : vector<8xf32> to vector<8x1xf32>
    %cst_15 = arith.constant 3.125000e-02 : f32
    %21 = vector.broadcast %cst_15 : f32 to vector<8x1xf32>
    %22 = arith.mulf %20, %21 : vector<8x1xf32>
    %23 = arith.mulf %17, %17 : vector<8x1xf32>
    %24 = arith.subf %22, %23 : vector<8x1xf32>
    %25 = vector.broadcast %17 : vector<8x1xf32> to vector<8x128xf32>
    %26 = arith.subf %13, %25 : vector<8x128xf32>
    %cst_16 = arith.constant 9.99999974E-6 : f32
    %27 = vector.broadcast %cst_16 : f32 to vector<8x1xf32>
    %28 = arith.addf %24, %27 : vector<8x1xf32>
    %29 = math.rsqrt %28 : vector<8x1xf32>
    %30 = vector.broadcast %29 : vector<8x1xf32> to vector<8x128xf32>
    %31 = arith.mulf %26, %30 : vector<8x128xf32>
    %32 = vector.broadcast %9 : vector<1x128xf32> to vector<8x128xf32>
    %33 = arith.mulf %31, %32 : vector<8x128xf32>
    %34 = vector.broadcast %10 : vector<1x128xf32> to vector<8x128xf32>
    %35 = arith.addf %33, %34 : vector<8x128xf32>
    %c0_17 = arith.constant 0 : index
    %c0_18 = arith.constant 0 : index
    %36 = vector.load %arg7[%c0_17, %c0_18] : memref<8x384xf32, #tpu.memory_space<vmem>>, vector<8x128xf32>
    tpu.vector_store %arg7[%c0_17, %c0_18], %35 {strides = array<i32>} : memref<8x384xf32, #tpu.memory_space<vmem>>, vector<8x128xf32>,
    %c0_19 = arith.constant 0 : index
    %c128 = arith.constant 128 : index
    %37 = vector.load %arg3[%c0_19, %c128] : memref<22x384xf32, #tpu.memory_space<vmem>>, vector<22x128xf32>
    %cst_20 = arith.constant dense<0.000000e+00> : vector<8x128xf32>
    %38 = tpu.matmul %0, %37, %cst_20 {dimension_numbers = #tpu.dot_dimension_numbers<[1], [0], [0], [1], [0, 0, 1, 1], [], []>} : vector<8x22xf32>, vector<22x128xf32>, vector<8x128xf32> -> vector<8x128xf32>
    %39 = arith.addf %38, %8 : vector<8x128xf32>
    %cst_21 = arith.constant dense<0.000000e+00> : vector<8xf32>
    %40 = vector.multi_reduction <add>, %39, %cst_21 [1] : vector<8x128xf32> to vector<8xf32>
    %41 = vector.shape_cast %40 : vector<8xf32> to vector<8x1xf32>
    %cst_22 = arith.constant 3.125000e-02 : f32
    %42 = vector.broadcast %cst_22 : f32 to vector<8x1xf32>
    %43 = arith.mulf %41, %42 : vector<8x1xf32>
    %44 = arith.mulf %39, %39 : vector<8x128xf32>
    %cst_23 = arith.constant dense<0.000000e+00> : vector<8xf32>
    %45 = vector.multi_reduction <add>, %44, %cst_23 [1] : vector<8x128xf32> to vector<8xf32>
    %46 = vector.shape_cast %45 : vector<8xf32> to vector<8x1xf32>
    %cst_24 = arith.constant 3.125000e-02 : f32
    %47 = vector.broadcast %cst_24 : f32 to vector<8x1xf32>
    %48 = arith.mulf %46, %47 : vector<8x1xf32>
    %49 = arith.mulf %43, %43 : vector<8x1xf32>
    %50 = arith.subf %48, %49 : vector<8x1xf32>
    %51 = vector.broadcast %43 : vector<8x1xf32> to vector<8x128xf32>
    %52 = arith.subf %39, %51 : vector<8x128xf32>
    %cst_25 = arith.constant 9.99999974E-6 : f32
    %53 = vector.broadcast %cst_25 : f32 to vector<8x1xf32>
    %54 = arith.addf %50, %53 : vector<8x1xf32>
    %55 = math.rsqrt %54 : vector<8x1xf32>
    %56 = vector.broadcast %55 : vector<8x1xf32> to vector<8x128xf32>
    %57 = arith.mulf %52, %56 : vector<8x128xf32>
    %58 = vector.broadcast %9 : vector<1x128xf32> to vector<8x128xf32>
    %59 = arith.mulf %57, %58 : vector<8x128xf32>
    %60 = vector.broadcast %10 : vector<1x128xf32> to vector<8x128xf32>
    %61 = arith.addf %59, %60 : vector<8x128xf32>
    %c0_26 = arith.constant 0 : index
    %c128_27 = arith.constant 128 : index
    %62 = vector.load %arg7[%c0_26, %c128_27] : memref<8x384xf32, #tpu.memory_space<vmem>>, vector<8x128xf32>
    tpu.vector_store %arg7[%c0_26, %c128_27], %61 {strides = array<i32>} : memref<8x384xf32, #tpu.memory_space<vmem>>, vector<8x128xf32>,
    %c0_28 = arith.constant 0 : index
    %c256 = arith.constant 256 : index
    %63 = vector.load %arg3[%c0_28, %c256] : memref<22x384xf32, #tpu.memory_space<vmem>>, vector<22x128xf32>
    %cst_29 = arith.constant dense<0.000000e+00> : vector<8x128xf32>
    %64 = tpu.matmul %0, %63, %cst_29 {dimension_numbers = #tpu.dot_dimension_numbers<[1], [0], [0], [1], [0, 0, 1, 1], [], []>} : vector<8x22xf32>, vector<22x128xf32>, vector<8x128xf32> -> vector<8x128xf32>
    %65 = arith.addf %64, %8 : vector<8x128xf32>
    %cst_30 = arith.constant dense<0.000000e+00> : vector<8xf32>
    %66 = vector.multi_reduction <add>, %65, %cst_30 [1] : vector<8x128xf32> to vector<8xf32>
    %67 = vector.shape_cast %66 : vector<8xf32> to vector<8x1xf32>
    %cst_31 = arith.constant 3.125000e-02 : f32
    %68 = vector.broadcast %cst_31 : f32 to vector<8x1xf32>
    %69 = arith.mulf %67, %68 : vector<8x1xf32>
    %70 = arith.mulf %65, %65 : vector<8x128xf32>
    %cst_32 = arith.constant dense<0.000000e+00> : vector<8xf32>
    %71 = vector.multi_reduction <add>, %70, %cst_32 [1] : vector<8x128xf32> to vector<8xf32>
    %72 = vector.shape_cast %71 : vector<8xf32> to vector<8x1xf32>
    %cst_33 = arith.constant 3.125000e-02 : f32
    %73 = vector.broadcast %cst_33 : f32 to vector<8x1xf32>
    %74 = arith.mulf %72, %73 : vector<8x1xf32>
    %75 = arith.mulf %69, %69 : vector<8x1xf32>
    %76 = arith.subf %74, %75 : vector<8x1xf32>
    %77 = vector.broadcast %69 : vector<8x1xf32> to vector<8x128xf32>
    %78 = arith.subf %65, %77 : vector<8x128xf32>
    %cst_34 = arith.constant 9.99999974E-6 : f32
    %79 = vector.broadcast %cst_34 : f32 to vector<8x1xf32>
    %80 = arith.addf %76, %79 : vector<8x1xf32>
    %81 = math.rsqrt %80 : vector<8x1xf32>
    %82 = vector.broadcast %81 : vector<8x1xf32> to vector<8x128xf32>
    %83 = arith.mulf %78, %82 : vector<8x128xf32>
    %84 = vector.broadcast %9 : vector<1x128xf32> to vector<8x128xf32>
    %85 = arith.mulf %83, %84 : vector<8x128xf32>
    %86 = vector.broadcast %10 : vector<1x128xf32> to vector<8x128xf32>
    %87 = arith.addf %85, %86 : vector<8x128xf32>
    %c0_35 = arith.constant 0 : index
    %c256_36 = arith.constant 256 : index
    %88 = vector.load %arg7[%c0_35, %c256_36] : memref<8x384xf32, #tpu.memory_space<vmem>>, vector<8x128xf32>
    tpu.vector_store %arg7[%c0_35, %c256_36], %87 {strides = array<i32>} : memref<8x384xf32, #tpu.memory_space<vmem>>, vector<8x128xf32>,
    return
  }
  func.func @transform_0(%arg0: i32) -> (i32, i32) {
    %c0_i32 = arith.constant 0 : i32
    %c0_i32_0 = arith.constant 0 : i32
    return %arg0, %c0_i32 : i32, i32
  }
  func.func @transform_1(%arg0: i32) -> (i32, i32) {
    %c0_i32 = arith.constant 0 : i32
    %c0_i32_0 = arith.constant 0 : i32
    return %arg0, %c0_i32 : i32, i32
  }
  func.func @transform_2(%arg0: i32) -> (i32, i32) {
    %c0_i32 = arith.constant 0 : i32
    %c0_i32_0 = arith.constant 0 : i32
    %c0_i32_1 = arith.constant 0 : i32
    return %c0_i32, %c0_i32_0 : i32, i32
  }
  func.func @transform_3(%arg0: i32) -> (i32, i32) {
    %c0_i32 = arith.constant 0 : i32
    %c0_i32_0 = arith.constant 0 : i32
    %c0_i32_1 = arith.constant 0 : i32
    return %c0_i32, %c0_i32_0 : i32, i32
  }
  func.func @transform_4(%arg0: i32) -> (i32, i32) {
    %c0_i32 = arith.constant 0 : i32
    %c0_i32_0 = arith.constant 0 : i32
    %c0_i32_1 = arith.constant 0 : i32
    return %c0_i32, %c0_i32_0 : i32, i32
  }
  func.func @transform_5(%arg0: i32) -> (i32, i32) {
    %c0_i32 = arith.constant 0 : i32
    %c0_i32_0 = arith.constant 0 : i32
    %c0_i32_1 = arith.constant 0 : i32
    return %c0_i32, %c0_i32_0 : i32, i32
  }
  func.func @transform_6(%arg0: i32) -> (i32, i32) {
    %c0_i32 = arith.constant 0 : i32
    %c0_i32_0 = arith.constant 0 : i32
    return %arg0, %c0_i32 : i32, i32
  }
}

</mosaic_0001>

<bundles_post_ra>
// kernel: tpu_custom_call.1
= control target key start
LH: loop header
LB: loop body
LE: loop exit
PB: predicated region body
PF: predicated region fallthrough
CT: control target
= control target key end

     0   :  { %11 = vsyncpa [#allocation3], 0  ;;  %s1296_s0 = inlined_call_operand.vmem [shape: f32[16,22], index: 0, kind: input, shape index: {}]   ;;  %s1297_s1 = inlined_call_operand.vmem [shape: s32[16,1], index: 1, kind: input, shape index: {}]   ;;  %s1298_s2 = inlined_call_operand.hbm [shape: f32[22,384], index: 2, kind: input, shape index: {}]   ;;  %s1299_s3 = inlined_call_operand.hbm [shape: f32[72,128], index: 3, kind: input, shape index: {}]   ;;  %s1300_s4 = inlined_call_operand.vmem [shape: f32[1,128], index: 4, kind: input, shape index: {}]   ;;  %s1301_s5 = inlined_call_operand.vmem [shape: f32[1,128], index: 5, kind: input, shape index: {}]   ;;  %s1302_s6 = inlined_call_operand.hbm [shape: f32[16,384], index: 6, kind: output, shape index: {}]  }
   0x1   :  { %12 = vsyncpa [#allocation6], 0 }
   0x2   :  { %13 = vsyncpa [#allocation4], 0 }
   0x3   :  { %15 = vsyncpa [#allocation4 + $0x1], 0  ;;  %s1126_s21 = smov 0   ;;  %s1128_s22 = smov 0  }
   0x4   :  { %s1130_s23 = smov 0   ;;  %s1132_s24 = smov 0  }
   0x5 LB: > { %s1147_s25 = sadd.s32 4294967295, %s1079_s24   ;;  %s790_s26 = sadd.s32 4294967294, %s1079_s24   ;;  %s1079_s24 = sphi %s1132_s24, %s1316_s24   ;;  %s1075_s23 = sphi %s1130_s23, %s1315_s23   ;;  %s1071_s22 = sphi %s1128_s22, %s1314_s22   ;;  %s1067_s21 = sphi %s1126_s21, %s1313_s21  }
   0x6   : > { %s1151_s27 = sadd.s32 1, %s1079_s24   ;;  %s164_s28 = sadd.s32 1, %s1075_s23 }
   0x7   : > { %s161_s29 = ssub.s32 %s1079_s24, %s1151_s27  ;;  %p174_p0 = scmp.ne.s32.totalorder %s1075_s23, %s1071_s22 }
   0x8   : > { %p162_p1 = scmp.eq.s32.totalorder %s161_s29, 0  ;;  %p175_p2 = scmp.eq.s32.totalorder %s1147_s25, 1 }
   0x9   : > { %p180_p3 = scmp.ne.s32.totalorder %s1071_s22, %s1067_s21  ;;  %p181_p4 = scmp.eq.s32.totalorder %s790_s26, 1 }
   0xa   : > { %s1162_s30 = scalar_select %p162_p1, %s1075_s23, %s164_s28  }
   0xb   : > { %p1164_p5 = por %p175_p2, %p174_p0  ;;  %p1168_p6 = por %p181_p4, %p180_p3 }
   0xc   : > { %p791_p7 = scmp.ge.s32.totalorder %s1079_s24, 1  ;;  %p188_p8 = scmp.lt.s32.totalorder %s1079_s24, 3 }
   0xd   : > { %s1305_s8 = scalar_select %p1168_p6, 1, 0 }
   0xe   : > { %p1303_p9 = scmp.eq.s32.totalorder %s1147_s25, 0  ;;  %p1175_p10 = pnand %p791_p7, %p188_p8 }
   0xf   : > { %s1081_s10 = smov [#allocation2]   ;;  %s1082_s13 = smov [#allocation5]  }
  0x10   : > { %s200_s11 = sshll.u32 %s1081_s10, 4  ;;  %p895_p11 = pneg %p1175_p10  ;;  %s201_s11 = int_to_ptr.vmem [resolvable:$true] %s200_s11 }
  0x11   : > { %s213_s14 = sshll.u32 %s1082_s13, 4  ;;  %s970_s15 = scalar_lea.vmem %s201_s11, 1152  ;;  %s214_s14 = int_to_ptr.vmem [resolvable:$true] %s213_s14 }
  0x12   : > { %p1183_p12 = pnand %p1303_p9, %p895_p11  ;;  %p971_p0 = scmp.ne.s32.totalorder %s201_s11, %s970_s15 }
  0x13   : > { %p978_p3 = scmp.lt.s32.totalorder %s201_s11, %s201_s11  ;;  %p979_p4 = scmp.lt.s32.totalorder %s970_s15, %s970_s15 }
  0x14   : > { %p961_p13 = pneg %p1183_p12 }
  0x15   : > { %p980_p7 = por %p979_p4, %p978_p3 }
  0x16   : > { %p973_p1 = pnand %p971_p0, %p961_p13 }
  0x18   : > { %p974_p2 = pneg %p973_p1 }
  0x1a   : > { %p981_p8 = pnand %p980_p7, %p974_p2 }
  0x1c   : > { %984 = shalt.err (!%p981_p8)
}
  0x1d   : > { %s1083_s16 = smov 384   ;;  %s1084_s17 = smov 24  }
  0x1e   : > { %898 = dma.hbm_to_vmem [thread:$0]  (!%p1183_p12), %s1298_s2, 1152, %s201_s11, [#allocation3], %s1083_s16, %s1083_s16, %s1084_s17  }
  0x1f   : > { %s996_s20 = scalar_lea.vmem %s214_s14, 1152  ;;  %p1004_p9 = scmp.lt.s32.totalorder %s214_s14, %s214_s14 }
  0x20   : > { %p997_p11 = scmp.ne.s32.totalorder %s214_s14, %s996_s20  ;;  %p1005_p6 = scmp.lt.s32.totalorder %s996_s20, %s996_s20 }
  0x22   : > { %p999_p0 = pnand %p997_p11, %p961_p13  ;;  %p1006_p3 = por %p1005_p6, %p1004_p9 }
  0x24   : > { %p1000_p1 = pneg %p999_p0 }
  0x26   : > { %p1007_p2 = pnand %p1006_p3, %p1000_p1 }
  0x28   : > { %1010 = shalt.err (!%p1007_p2)
}
  0x29   : > { %s1085_s26 = smov 128   ;;  %s1086_s28 = smov 8  }
  0x2a   : > { %901 = dma.hbm_to_vmem [thread:$0]  (!%p1183_p12), %s1299_s3, 1152, %s214_s14, [#allocation6], %s1085_s26, %s1085_s26, %s1086_s28  }
  0x2b   : > { %249 = sbr.rel (%p1175_p10) target bundleno = 573 (0x23d), region = 44  ;;  %p1308_p4 = scmp.eq.s32.totalorder (!%p1175_p10), %s1147_s25, 0 }
  0x30   : > { %1054 = dma.done.wait (%p1308_p4), [#allocation3], 1152   ;;  %p1309_p13 = pmov %p1308_p4 }
  0x31   : > { %p1310_p6 = pmov %p1308_p4 }
  0x32   : > { %1056 = vsyncadd (%p1309_p13), [#allocation3], 4294966144 }
  0x33   : > { %1058 = dma.done.wait (%p1310_p6), [#allocation6], 1152   ;;  %p1311_p9 = pmov %p1308_p4 }
  0x34   : > { %p286_p7 = scmp.lt.s32.totalorder %s1147_s25, 1  ;;  %v1087_v0 = vmov 0   ;;  %v1088_v1 = vmov 0.0   ;;  %vm1089_vm0 = vmmov 0   ;;  %vm396_vm1 = vcmask 1045504   ;;  %v312_v3 = vld [vmem:[#allocation5 + $0x40] sm:$0xff] }
  0x35   : > { %1060 = vsyncadd (%p1311_p9), [#allocation6], 4294966144  ;;  %952 = vset.pattern.permute.xlu0 %v1087_v0  ;;  %835 = vmatprep.subr.mxu0 %v1088_v1  ;;  %v391_v4 = vld [vmem:[#allocation2 + $0x30] sm:$0x3f]  ;;  %v311_v5 = vld [vmem:[#allocation5 + $0x38] sm:$0xff]  ;;  %vm392_vm2 = vcmask 179200   ;;  %v296_v22 = vlaneseq }
  0x36   : > { %s287_s9 = scalar_select %p286_p7, %s1147_s25, 1  ;;  %856 = vmatprep.subr.mxu1 %v1088_v1  ;;  %862 = vmatprep.mubr.msk.f32.mxu1 %vm1089_vm0, %v1088_v1  ;;  %v390_v6 = vld [vmem:[#allocation2 + $0x18] sm:$0xff]  ;;  %v389_v8 = vld [vmem:[#allocation2] sm:$0xff]  ;;  %v309_v9 = vld [vmem:[#allocation5 + $0x28] sm:$0xff]  ;;  %vm313_vm3 = vcmask 588800  }
  0x37   : > { %853 = vmatprep.mubr.msk.f32.mxu0 %vm1089_vm0, %v1088_v1  ;;  %836 = vmatpush3.msra.mxu0 %v312_v3  ;;  %v310_v7 = vld [vmem:[#allocation5 + $0x30] sm:$0xff]  ;;  %v308_v12 = vld [vmem:[#allocation5 + $0x20] sm:$0xff]  ;;  %v499_v13 = vld [vmem:[#allocation2 + $0x20] sm:$0xff]  ;;  %v297_v23 = vand.u32 127, %v296_v22  ;;  %s283_s18 = sand.u32 1, %s1071_s22  }
  0x38   : > { %s798_s11 = sshll.u32 %s287_s9, 3  ;;  %857 = vmatpush3.msk.msra.mxu1 %vm396_vm1, %v391_v4  ;;  %837 = vmatprep.subr.mxu0 %v1088_v1  ;;  %v500_v11 = vld [vmem:[#allocation2 + $0x38] sm:$0x3f]  ;;  %v307_v14 = vld [vmem:[#allocation5 + $0x18] sm:$0xff]  ;;  %v498_v15 = vld [vmem:[#allocation2 + $0x8] sm:$0xff]  ;;  %s883_s19 = smul.u32 24, %s283_s18 }
  0x39   : > { %s293_s14 = scalar_lea.vmem %s1297_s1, %s798_s11  ;;  %s289_s17 = scalar_lea.vmem %s1296_s0, %s798_s11  ;;  %858 = vmatprep.subr.mxu1 %v1088_v1  ;;  %838 = vmatpush3.msra.mxu0 %v311_v5  ;;  %v306_v16 = vld [vmem:[#allocation5 + $0x10] sm:$0xff]  ;;  %v592_v17 = vld [vmem:[#allocation2 + $0x40] sm:$0x3f]  ;;  %v305_v18 = vld [vmem:[#allocation5 + $0x8] sm:$0xff] }
  0x3a   : > { %v295_v2 = vld [vmem:[%s293_s14] sm:$0xff]  ;;  %859 = vmatpush3.msra.mxu1 %v390_v6  ;;  %839 = vmatprep.subr.mxu0 %v1088_v1  ;;  %v591_v19 = vld [vmem:[#allocation2 + $0x28] sm:$0xff]  ;;  %v590_v21 = vld [vmem:[#allocation2 + $0x10] sm:$0xff]  ;;  %s285_s10 = scalar_lea.vmem [#allocation7], %s883_s19  ;;  %s884_s9 = smul.u32 384, %s1147_s25 }
  0x3b   : > { %299 = vperm.xlu0 %952, %v295_v2   ;;  %860 = vmatprep.subr.mxu1 %v1088_v1  ;;  %v294_v10 = vld [vmem:[%s289_s17] sm:$0xff]  ;;  %v304_v20 = vld [vmem:[#allocation5] sm:$0xff]  ;;  %s697_s11 = sshll.u32 %s285_s10, 4  ;;  %s683_s15 = scalar_lea.sflag [#allocation4], %s283_s18  ;;  %s698_s11 = int_to_ptr.vmem [resolvable:$true] %s697_s11 }
  0x3c   : > { %840 = vmatpush3.msra.mxu0 %v310_v7  ;;  %861 = vmatpush3.msra.mxu1 %v389_v8  ;;  %v804_v63 = vld [vmem:[%s1300_s4] ss:$0 sm:$0xff]  ;;  %s695_s14 = scalar_lea.hbm %s1302_s6, %s884_s9  ;;  %s1011_s16 = scalar_lea.vmem %s698_s11, 384 }
  0x3d   : > { %841 = vmatprep.subr.mxu0 %v1088_v1  ;;  %865 = vmatprep.subr.mxu1 %v1088_v1  ;;  %p1012_p10 = scmp.ne.s32.totalorder %s698_s11, %s1011_s16  ;;  %s1090_s17 = smov [#allocation7]  }
  0x3e   : > { %842 = vmatpush3.msra.mxu0 %v309_v9  ;;  %863 = vmatmul.mubr.msk.f32.vlgmr.msra.gmra.mxu1 %vm392_vm2, %v294_v10  ;;  %s1015_s19 = sshll.u32 %s1090_s17, 4  ;;  %s1016_s19 = int_to_ptr.vmem [resolvable:$false] %s1015_s19 }
  0x3f   : > { %843 = vmatprep.subr.mxu0 %v1088_v1  ;;  %866 = vmatpush3.msk.msra.mxu1 %vm396_vm1, %v500_v11  ;;  %p1013_p12 = pnand %p1012_p10, %p1164_p5  ;;  %s1017_s25 = scalar_lea.vmem %s1016_s19, 768 }
  0x40   : > { %844 = vmatpush3.msra.mxu0 %v308_v12  ;;  %867 = vmatprep.subr.mxu1 %v1088_v1  ;;  %p1018_p11 = scmp.lt.s32.totalorder %s698_s11, %s1016_s19  ;;  %p1019_p0 = scmp.lt.s32.totalorder %s1017_s25, %s1011_s16 }
  0x41   : > { %845 = vmatprep.subr.mxu0 %v1088_v1  ;;  %868 = vmatpush3.msra.mxu1 %v499_v13  ;;  %p1014_p8 = pneg %p1013_p12 }
  0x42   : > { %846 = vmatpush3.msra.mxu0 %v307_v14  ;;  %869 = vmatprep.subr.mxu1 %v1088_v1  ;;  %p1020_p1 = por %p1019_p0, %p1018_p11 }
  0x43   : > { %847 = vmatprep.subr.mxu0 %v1088_v1  ;;  %870 = vmatpush3.msra.mxu1 %v498_v15 }
  0x44   : > { %871 = vmatprep.mubr.msk.f32.mxu1 %vm1089_vm0, %v1088_v1  ;;  %874 = vmatprep.subr.mxu1 %v1088_v1  ;;  %p1021_p3 = pnand %p1020_p1, %p1014_p8 }
  0x45   : > { %848 = vmatpush3.msra.mxu0 %v306_v16  ;;  %872 = vmatmul.mubr.msk.f32.vlgmr.msra.gmra.mxu1 %vm392_vm2, %v294_v10 }
  0x46   : > { %849 = vmatprep.subr.mxu0 %v1088_v1  ;;  %875 = vmatpush3.msk.msra.mxu1 %vm396_vm1, %v592_v17 }
  0x47   : > { %850 = vmatpush3.msra.mxu0 %v305_v18  ;;  %876 = vmatprep.subr.mxu1 %v1088_v1 }
  0x48   : > { %851 = vmatprep.subr.mxu0 %v1088_v1  ;;  %877 = vmatpush3.msra.mxu1 %v591_v19 }
  0x49   : > { %852 = vmatpush3.msra.mxu0 %v304_v20  ;;  %878 = vmatprep.subr.mxu1 %v1088_v1 }
  0x4a   : > { %880 = vmatprep.mubr.msk.f32.mxu1 %vm1089_vm0, %v1088_v1  ;;  %879 = vmatpush3.msra.mxu1 %v590_v21 }
  0x4b   : > { %881 = vmatmul.mubr.msk.f32.vlgmr.msra.gmra.mxu1 %vm392_vm2, %v294_v10 }
  0xb6   : > { %v300_v24 = vpop.permute.xlu0 %299 }
  0xb7   : > { %vm301_vm4 = vcmp.eq.s32.totalorder %v300_v24, %v297_v23 }
  0xb8   : > { %v800_v25 = vsel %vm301_vm4, 1.0, %v1088_v1  ;;  %v805_v1 = vld [vmem:[%s1301_s5] ss:$0 sm:$0xff] }
  0xb9   : > { %854 = vmatmul.mubr.msk.f32.vlgmr.msra.gmra.mxu0 %vm313_vm3, %v800_v25 }
  0xfe   : > { %v466_v26 = vpop.f32.mrf.mxu1 }
 0x100   : > { %v864_v27 = vpop.f32.mrf.mxu1 }
 0x105   : > { %v570_v28 = vpop.f32.mrf.mxu1 }
 0x107   : > { %v873_v29 = vpop.f32.mrf.mxu1 }
 0x10b   : > { %v662_v30 = vpop.f32.mrf.mxu1 }
 0x10d   : > { %v882_v31 = vpop.f32.mrf.mxu1 }
 0x179   : > { %v383_v32 = vpop.f32.mrf.mxu0 }
 0x17a   : > { %v467_v33 = vadd.f32 %v466_v26, %v383_v32  ;;  %v571_v34 = vadd.f32 %v570_v28, %v383_v32  ;;  %v663_v36 = vadd.f32 %v662_v30, %v383_v32 }
 0x17b   : > { %v855_v35 = vpop.f32.mrf.mxu0 }
 0x17c   : > { %470 = vadd.xlane.f32.xlu0 %v467_v33  ;;  %574 = vadd.xlane.f32.xlu1 %v571_v34  ;;  %v473_v37 = vmul.f32 %v467_v33, %v467_v33  ;;  %v577_v38 = vmul.f32 %v571_v34, %v571_v34  ;;  %v669_v39 = vmul.f32 %v663_v36, %v663_v36 }
 0x180   : > { %666 = vadd.xlane.f32.xlu1 %v663_v36 }
 0x184   : > { %474 = vadd.xlane.f32.xlu1 %v473_v37 }
 0x188   : > { %578 = vadd.xlane.f32.xlu1 %v577_v38 }
 0x18c   : > { %670 = vadd.xlane.f32.xlu1 %v669_v39 }
 0x205   : > { %v575_v40 = vpop.xlane.xlu1 %574  ;;  %v471_v41 = vpop.xlane.xlu0 %470 }
 0x206   : > { %v472_v43 = vmul.f32 0.03125, %v471_v41  ;;  %v576_v46 = vmul.f32 0.03125, %v575_v40 }
 0x208   : > { %v477_v45 = vmul.f32 %v472_v43, %v472_v43  ;;  %v581_v50 = vmul.f32 %v576_v46, %v576_v46  ;;  %v479_v61 = vsub.f32 %v467_v33, %v472_v43  ;;  %v583_v2 = vsub.f32 %v571_v34, %v576_v46 }
 0x209   : > { %v667_v42 = vpop.xlane.xlu1 %666 }
 0x20a   : > { %v668_v51 = vmul.f32 0.03125, %v667_v42 }
 0x20c   : > { %v673_v56 = vmul.f32 %v668_v51, %v668_v51  ;;  %v675_v7 = vsub.f32 %v663_v36, %v668_v51 }
 0x20d   : > { %v475_v44 = vpop.xlane.xlu1 %474 }
 0x20e   : > { %v476_v47 = vmul.f32 0.03125, %v475_v44 }
 0x210   : > { %v478_v48 = vsub.f32 %v476_v47, %v477_v45 }
 0x211   : > { %v579_v49 = vpop.xlane.xlu1 %578 }
 0x212   : > { %v480_v52 = vadd.f32 1e-05, %v478_v48  ;;  %v580_v53 = vmul.f32 0.03125, %v579_v49 }
 0x214   : > { %953 = vrsqrt.f32 %v480_v52  ;;  %v582_v54 = vsub.f32 %v580_v53, %v581_v50 }
 0x215   : > { %v671_v55 = vpop.xlane.xlu1 %670 }
 0x216   : > { %v584_v57 = vadd.f32 1e-05, %v582_v54  ;;  %v672_v58 = vmul.f32 0.03125, %v671_v55 }
 0x218   : > { %955 = vrsqrt.f32 %v584_v57  ;;  %v674_v59 = vsub.f32 %v672_v58, %v673_v56 }
 0x21a   : > { %v676_v60 = vadd.f32 1e-05, %v674_v59 }
 0x21c   : > { %957 = vrsqrt.f32 %v676_v60 }
 0x221   : > { %v954_v62 = vpop.eup %953 }
 0x222   : > { %v482_v0 = vmul.f32 %v954_v62, %v479_v61 }
 0x224   : > { %v489_v3 = vmul.f32 %v804_v63, %v482_v0 }
 0x225   : > { %v956_v4 = vpop.eup %955 }
 0x226   : > { %v586_v5 = vmul.f32 %v956_v4, %v583_v2  ;;  %v496_v6 = vadd.f32 %v805_v1, %v489_v3 }
 0x228   : > { %497 = vst [vmem:[%s285_s10] sm:$0xff] %v496_v6  ;;  %v587_v8 = vmul.f32 %v804_v63, %v586_v5 }
 0x229   : > { %v958_v9 = vpop.eup %957 }
 0x22a   : > { %v678_v10 = vmul.f32 %v958_v9, %v675_v7  ;;  %v588_v11 = vadd.f32 %v805_v1, %v587_v8 }
 0x22c   : > { %589 = vst [vmem:[%s285_s10 + $0x8] sm:$0xff] %v588_v11  ;;  %v679_v12 = vmul.f32 %v804_v63, %v678_v10 }
 0x22e   : > { %v680_v13 = vadd.f32 %v805_v1, %v679_v12 }
 0x230   : > { %681 = vst [vmem:[%s285_s10 + $0x10] sm:$0xff] %v680_v13 }
 0x231   : > { %1024 = shalt.err (!%p1021_p3)
}
 0x232   : > { %s1025_s20 = scalar_lea.hbm %s695_s14, 384  ;;  %s1029_s28 = scalar_lea.hbm %s1302_s6, 768 }
 0x233   : > { %p1026_p2 = scmp.ne.s32.totalorder %s695_s14, %s1025_s20  ;;  %p1030_p6 = scmp.lt.s32.totalorder %s695_s14, %s1302_s6 }
 0x234   : > { %p1031_p9 = scmp.lt.s32.totalorder %s1029_s28, %s1025_s20 }
 0x235   : > { %p1027_p4 = pnand %p1026_p2, %p1164_p5 }
 0x236   : > { %p1032_p7 = por %p1031_p9, %p1030_p6 }
 0x237   : > { %p1028_p13 = pneg %p1027_p4 }
 0x239   : > { %p1033_p10 = pnand %p1032_p7, %p1028_p13 }
 0x23b   : > { %1036 = shalt.err (!%p1033_p10)
}
 0x23c   : > { %893 = dma.vmem_to_hbm [thread:$0]  (%p1164_p5), %s698_s11, 384, %s695_s14, %s683_s15  }
 0x23d PF: > { %p910_p12 = scmp.ge.s32.totalorder %s1079_s24, 2  ;;  %s709_s9 = sand.u32 1, %s1067_s21  }
 0x23e   : > { %p1312_p8 = scmp.ne.s32.totalorder %s1305_s8, 0  ;;  %s710_s12 = scalar_lea.sflag [#allocation4], %s709_s9 }
 0x240   : > { %p903_p11 = pnand %p910_p12, %p1312_p8 }
 0x242   : > { %p904_p0 = pneg %p903_p11 }
 0x244   : > { %1062 = dma.done.wait (%p904_p0), %s710_s12, 384  }
 0x245   : > { %1064 = vsyncadd (%p904_p0), %s710_s12, 4294966912  ;;  %p18_p1 = scmp.ge.s32.totalorder %s1151_s27, 4   ;;  %s1313_s21 = smov %s1071_s22 }
 0x246   : > { %s1314_s22 = smov %s1075_s23  ;;  %s1315_s23 = smov %s1162_s30 }
 0x247   : > { %s1316_s24 = smov %s1151_s27  ;;  %20 = sbr.rel (!%p18_p1) target bundleno = 5 (0x5), region = 91 }
 0x24c   :  { %715 = vsyncpa [#allocation3], 1 }
 0x24d   :  { %717 = vsyncpa [#allocation3 + $0x1], 1 }
 0x24e   :  { %718 = vsyncpa [#allocation6], 1 }
 0x24f   :  { %719 = vsyncpa [#allocation4], 1 }
 0x250   :  { %721 = vsyncpa [#allocation4 + $0x1], 1 }

</bundles_post_ra>
